<compile_context>
chip_gen: v6e
topology: v6e:2x2x1
jax: 0.10.0
libtpu: 0.0.40
codegen_flags: <defaults>
</compile_context>

<pallas_src>
import functools

import jax
import jax.numpy as jnp
from jax import lax
from jax.experimental import pallas as pl
from jax.experimental.pallas import tpu as pltpu


def _round_up(x, m):
    return (x + m - 1) // m * m


# --------------------------------------------------------------------------- #
# Kernel
# --------------------------------------------------------------------------- #
def _cnn_seq2seq_kernel(src_i2c_ref, tgt_i2c_ref,
                        w_enc_ref, b_enc_ref,
                        w_dec_enc_ref, w_dec_tgt_ref, b_dec_ref,
                        w_fc_ref, b_fc_ref,
                        out_ref, *, kernel_size, seq_len):
    K = kernel_size
    pad = K // 2
    L = seq_len
    rows = src_i2c_ref.shape[0]           # (#batches in this block) * L
    C = w_enc_ref.shape[1]

    # ---- encoder Conv1d(E -> C): single im2col matmul on the MXU -----------
    enc = jnp.dot(src_i2c_ref[...], w_enc_ref[...],
                  preferred_element_type=jnp.float32)
    enc = enc + b_enc_ref[...]                                   # (rows, C) f32

    # ---- decoder Conv1d(C+E -> C): contraction split, no channel concat ----
    # tgt half (im2col pre-built in the wrapper) -> one matmul.
    dec = jnp.dot(tgt_i2c_ref[...], w_dec_tgt_ref[...],
                  preferred_element_type=jnp.float32)
    dec = dec + b_dec_ref[...]                                   # (rows, C) f32

    # enc half: build the (rows, K*C) im2col in-register.  Time shifts are
    # sublane rotations (XLU slot, essentially free); rows whose shifted
    # position falls outside the sequence are zeroed (conv zero padding).
    # Each grid block contains only whole sequences, so the cyclic roll never
    # leaks valid data across sequence boundaries (those rows are masked).
    t = lax.broadcasted_iota(jnp.int32, (rows, C), 0) % L
    cols = []
    for k in range(K):
        d = k - pad                       # static tap offset
        if d == 0:
            cols.append(enc)
        else:
            shifted = pltpu.roll(enc, shift=(-d) % rows, axis=0)  # [r] = enc[r+d]
            valid = (t + d >= 0) & (t + d <= L - 1)
            cols.append(jnp.where(valid, shifted, 0.0))
    enc_i2c = jnp.concatenate(cols, axis=-1)                     # (rows, K*C)
    dec = dec + jnp.dot(enc_i2c.astype(w_dec_enc_ref.dtype), w_dec_enc_ref[...],
                        preferred_element_type=jnp.float32)

    # ---- fc_out: Linear(C -> O), lane-dense padded output ------------------
    out = jnp.dot(dec.astype(w_fc_ref.dtype), w_fc_ref[...],
                  preferred_element_type=jnp.float32)
    out_ref[...] = out + b_fc_ref[...]


# --------------------------------------------------------------------------- #
# Wrapper / parameter preparation
# --------------------------------------------------------------------------- #
def _im2col_time(x, K):
    """x: (B, L, E) -> (B, L, K*E), taps ordered k=0..K-1 (offset k - K//2)."""
    B, L, E = x.shape
    pad = K // 2
    xp = jnp.pad(x, ((0, 0), (pad, pad), (0, 0)))
    return jnp.concatenate([xp[:, k:k + L, :] for k in range(K)], axis=-1)


def prepare_params(params, kernel_size, compute_dtype=jnp.float32):
    """Convert torch-layout params to kernel layout ONCE (hoisted out of fwd)."""
    K = kernel_size
    C, E, _ = params["w_enc"].shape                     # (C_out, E, K)
    O = params["w_fc"].shape[0]
    O_pad = _round_up(O, 128)                           # lane-dense output

    def conv_w_i2c(w):                                  # (Cout, Cin, K) -> (K*Cin, Cout)
        Cout, Cin, _ = w.shape
        return jnp.transpose(w, (2, 1, 0)).reshape(K * Cin, Cout).astype(compute_dtype)

    w_dec = params["w_dec"]                             # (C, C+E, K)
    w_fc = jnp.transpose(params["w_fc"], (1, 0))        # (C, O)
    w_fc_pad = jnp.zeros((C, O_pad), compute_dtype).at[:, :O].set(
        w_fc.astype(compute_dtype))
    b_fc_pad = jnp.zeros((1, O_pad), jnp.float32).at[:, :O].set(
        params["b_fc"].astype(jnp.float32))

    return {
        "emb_src": params["emb_src"].astype(compute_dtype),
        "emb_tgt": params["emb_tgt"].astype(compute_dtype),
        "w_enc": conv_w_i2c(params["w_enc"]),           # (K*E, C)
        "b_enc": params["b_enc"].reshape(1, C).astype(jnp.float32),
        "w_dec_enc": conv_w_i2c(w_dec[:, :C, :]),       # (K*C, C)
        "w_dec_tgt": conv_w_i2c(w_dec[:, C:, :]),       # (K*E, C)
        "b_dec": params["b_dec"].reshape(1, C).astype(jnp.float32),
        "w_fc": w_fc_pad,                               # (C, O_pad)
        "b_fc": b_fc_pad,                               # (1, O_pad)
    }


def cnn_seq2seq_forward(kparams, src, tgt, *, kernel_size, out_dim):
    """Embedding gathers + im2col glue in XLA; conv/conv/fc fused in Pallas."""
    # TODO(synk): even kernel_size changes the conv output length; only odd K supported.
    assert kernel_size % 2 == 1
    K = kernel_size
    src_emb = kparams["emb_src"][src]                   # (B, L, E)
    tgt_emb = kparams["emb_tgt"][tgt]                   # (B, S_tgt, E)
    B, L, E = src_emb.shape
    S_tgt = tgt_emb.shape[1]
    if S_tgt >= L:
        tgt_emb = tgt_emb[:, :L, :]
    else:
        tgt_emb = jnp.pad(tgt_emb, ((0, 0), (0, L - S_tgt), (0, 0)))

    rows = B * L
    src_i2c = _im2col_time(src_emb, K).reshape(rows, K * E)
    tgt_i2c = _im2col_time(tgt_emb, K).reshape(rows, K * E)

    C = kparams["w_enc"].shape[1]
    O_pad = kparams["w_fc"].shape[1]

    # Whole batch folded into the row axis.  Split into 2 batch-aligned,
    # 8-row-aligned blocks when possible so both v7x TensorCores are fed
    # (harmless on 1-TC v5e/v6e); otherwise one block = the full batch.
    n_blocks = 1
    if B % 2 == 0 and ((B // 2) * L) % 8 == 0:
        n_blocks = 2
    rows_blk = rows // n_blocks

    flops = 2 * rows * (K * E * C        # encoder im2col matmul
                        + K * E * C      # decoder, tgt half
                        + K * C * C      # decoder, enc half
                        + C * O_pad)     # fc_out
    bytes_accessed = sum(int(a.size) * a.dtype.itemsize for a in
                         (src_i2c, tgt_i2c, kparams["w_enc"], kparams["b_enc"],
                          kparams["w_dec_enc"], kparams["w_dec_tgt"],
                          kparams["b_dec"], kparams["w_fc"], kparams["b_fc"]))
    bytes_accessed += rows * O_pad * 4   # output

    kern = functools.partial(_cnn_seq2seq_kernel, kernel_size=K, seq_len=L)
    out = pl.pallas_call(
        kern,
        out_shape=jax.ShapeDtypeStruct((rows, O_pad), jnp.float32),
        grid=(n_blocks,),
        in_specs=[
            pl.BlockSpec((rows_blk, K * E), lambda i: (i, 0)),   # src im2col
            pl.BlockSpec((rows_blk, K * E), lambda i: (i, 0)),   # tgt im2col
            pl.BlockSpec((K * E, C), lambda i: (0, 0)),          # enc weight (im2col)
            pl.BlockSpec((1, C), lambda i: (0, 0)),              # enc bias
            pl.BlockSpec((K * C, C), lambda i: (0, 0)),          # dec weight, enc part
            pl.BlockSpec((K * E, C), lambda i: (0, 0)),          # dec weight, tgt part
            pl.BlockSpec((1, C), lambda i: (0, 0)),              # dec bias
            pl.BlockSpec((C, O_pad), lambda i: (0, 0)),          # fc weight (lane padded)
            pl.BlockSpec((1, O_pad), lambda i: (0, 0)),          # fc bias (lane padded)
        ],
        out_specs=pl.BlockSpec((rows_blk, O_pad), lambda i: (i, 0)),
        compiler_params=pltpu.CompilerParams(
            dimension_semantics=("parallel",)),
        cost_estimate=pl.CostEstimate(flops=flops, transcendentals=0,
                                      bytes_accessed=bytes_accessed),
    )(src_i2c, tgt_i2c, kparams["w_enc"], kparams["b_enc"],
      kparams["w_dec_enc"], kparams["w_dec_tgt"], kparams["b_dec"],
      kparams["w_fc"], kparams["b_fc"])

    return out[:, :out_dim].reshape(B, L, out_dim)


# --------------------------------------------------------------------------- #
# Pure-JAX reference (torch semantics, channel-last)
# --------------------------------------------------------------------------- #
def _conv1d_ref(x, w, b, pad):
    # x: (B, L, Cin); w: torch layout (Cout, Cin, K); b: (Cout,)
    B, L, Cin = x.shape
    Cout, _, K = w.shape
    xp = jnp.pad(x, ((0, 0), (pad, pad), (0, 0)))
    out = jnp.zeros((B, L, Cout), jnp.float32) + b
    for k in range(K):
        out = out + jnp.einsum('blc,oc->blo', xp[:, k:k + L, :], w[:, :, k])
    return out


def reference_forward(params, src, tgt, kernel_size):
    pad = kernel_size // 2
    src_emb = params["emb_src"][src]
    tgt_emb = params["emb_tgt"][tgt]
    B, L, E = src_emb.shape
    S_tgt = tgt_emb.shape[1]
    if S_tgt >= L:
        tgt_emb = tgt_emb[:, :L, :]
    else:
        tgt_emb = jnp.pad(tgt_emb, ((0, 0), (0, L - S_tgt), (0, 0)))
    enc = _conv1d_ref(src_emb, params["w_enc"], params["b_enc"], pad)
    dec_in = jnp.concatenate([enc, tgt_emb], axis=-1)
    dec = _conv1d_ref(dec_in, params["w_dec"], params["b_dec"], pad)
    return jnp.einsum('blc,oc->blo', dec, params["w_fc"]) + params["b_fc"]


# --------------------------------------------------------------------------- #
if __name__ == "__main__":
    input_dim, output_dim = 32, 24        # vocab sizes
    embed_dim, kernel_size, num_channels = 8, 3, 16
    B, S_src, S_tgt = 2, 16, 12

    key = jax.random.PRNGKey(0)
    keys = jax.random.split(key, 10)
    params = {
        "emb_src": 0.1 * jax.random.normal(keys[0], (input_dim, embed_dim), jnp.float32),
        "emb_tgt": 0.1 * jax.random.normal(keys[1], (output_dim, embed_dim), jnp.float32),
        "w_enc": 0.1 * jax.random.normal(keys[2], (num_channels, embed_dim, kernel_size), jnp.float32),
        "b_enc": 0.1 * jax.random.normal(keys[3], (num_channels,), jnp.float32),
        "w_dec": 0.1 * jax.random.normal(keys[4], (num_channels, num_channels + embed_dim, kernel_size), jnp.float32),
        "b_dec": 0.1 * jax.random.normal(keys[5], (num_channels,), jnp.float32),
        "w_fc": 0.1 * jax.random.normal(keys[6], (output_dim, num_channels), jnp.float32),
        "b_fc": 0.1 * jax.random.normal(keys[7], (output_dim,), jnp.float32),
    }
    src = jax.random.randint(keys[8], (B, S_src), 0, input_dim)
    tgt = jax.random.randint(keys[9], (B, S_tgt), 0, output_dim)

    ref = reference_forward(params, src, tgt, kernel_size)

    fwd = jax.jit(functools.partial(cnn_seq2seq_forward,
                                    kernel_size=kernel_size, out_dim=output_dim))

    # f32 path (tight check).
    kp32 = prepare_params(params, kernel_size, jnp.float32)
    out32 = fwd(kp32, src, tgt)
    jax.block_until_ready(out32)
    assert out32.shape == (B, S_src, output_dim), out32.shape
    err32 = float(jnp.max(jnp.abs(out32 - ref)))
    assert err32 < 1e-4, err32

    # bf16-MXU-operand path (f32 accumulation in-kernel), loose check.
    kp16 = prepare_params(params, kernel_size, jnp.bfloat16)
    out16 = fwd(kp16, src, tgt)
    jax.block_until_ready(out16)
    err16 = float(jnp.max(jnp.abs(out16 - ref)))
    assert err16 < 5e-2, err16

    print("KERNEL_OK")
</pallas_src>

<mosaic_0001>
module attributes {stable_mosaic.version = 11 : i64} {
  func.func @_cnn_seq2seq_kernel(%arg0: i32, %arg1: memref<16x24xf32, #tpu.memory_space<vmem>>, %arg2: memref<16x24xf32, #tpu.memory_space<vmem>>, %arg3: memref<24x16xf32, #tpu.memory_space<vmem>>, %arg4: memref<1x16xf32, #tpu.memory_space<vmem>>, %arg5: memref<48x16xf32, #tpu.memory_space<vmem>>, %arg6: memref<24x16xf32, #tpu.memory_space<vmem>>, %arg7: memref<1x16xf32, #tpu.memory_space<vmem>>, %arg8: memref<16x128xf32, #tpu.memory_space<vmem>>, %arg9: memref<1x128xf32, #tpu.memory_space<vmem>>, %arg10: memref<16x128xf32, #tpu.memory_space<vmem>>) attributes {dimension_semantics = [#tpu.dimension_semantics<parallel>], iteration_bounds = array<i64: 2>, scalar_prefetch = 0 : i64, scratch_operands = 0 : i64, tpu.core_type = #tpu.core_type<tc>, window_params = [{transform_indices = @transform_0, window_bounds = array<i64: 16, 24>}, {transform_indices = @transform_1, window_bounds = array<i64: 16, 24>}, {pipeline_mode = #tpu.pipeline_mode<synchronous>, transform_indices = @transform_2, window_bounds = array<i64: 24, 16>}, {pipeline_mode = #tpu.pipeline_mode<synchronous>, transform_indices = @transform_3, window_bounds = array<i64: 1, 16>}, {pipeline_mode = #tpu.pipeline_mode<synchronous>, transform_indices = @transform_4, window_bounds = array<i64: 48, 16>}, {pipeline_mode = #tpu.pipeline_mode<synchronous>, transform_indices = @transform_5, window_bounds = array<i64: 24, 16>}, {pipeline_mode = #tpu.pipeline_mode<synchronous>, transform_indices = @transform_6, window_bounds = array<i64: 1, 16>}, {pipeline_mode = #tpu.pipeline_mode<synchronous>, transform_indices = @transform_7, window_bounds = array<i64: 16, 128>}, {pipeline_mode = #tpu.pipeline_mode<synchronous>, transform_indices = @transform_8, window_bounds = array<i64: 1, 128>}, {transform_indices = @transform_9, window_bounds = array<i64: 16, 128>}]} {
    %c0 = arith.constant 0 : index
    %c0_0 = arith.constant 0 : index
    %0 = vector.load %arg1[%c0, %c0_0] : memref<16x24xf32, #tpu.memory_space<vmem>>, vector<16x24xf32>
    %c0_1 = arith.constant 0 : index
    %c0_2 = arith.constant 0 : index
    %1 = vector.load %arg3[%c0_1, %c0_2] : memref<24x16xf32, #tpu.memory_space<vmem>>, vector<24x16xf32>
    %cst = arith.constant dense<0.000000e+00> : vector<16x16xf32>
    %2 = tpu.matmul %0, %1, %cst {dimension_numbers = #tpu.dot_dimension_numbers<[1], [0], [0], [1], [0, 0, 1, 1], [], []>} : vector<16x24xf32>, vector<24x16xf32>, vector<16x16xf32> -> vector<16x16xf32>
    %c0_3 = arith.constant 0 : index
    %c0_4 = arith.constant 0 : index
    %3 = vector.load %arg4[%c0_3, %c0_4] : memref<1x16xf32, #tpu.memory_space<vmem>>, vector<1x16xf32>
    %4 = vector.broadcast %3 : vector<1x16xf32> to vector<16x16xf32>
    %5 = arith.addf %2, %4 : vector<16x16xf32>
    %c0_5 = arith.constant 0 : index
    %c0_6 = arith.constant 0 : index
    %6 = vector.load %arg2[%c0_5, %c0_6] : memref<16x24xf32, #tpu.memory_space<vmem>>, vector<16x24xf32>
    %c0_7 = arith.constant 0 : index
    %c0_8 = arith.constant 0 : index
    %7 = vector.load %arg6[%c0_7, %c0_8] : memref<24x16xf32, #tpu.memory_space<vmem>>, vector<24x16xf32>
    %cst_9 = arith.constant dense<0.000000e+00> : vector<16x16xf32>
    %8 = tpu.matmul %6, %7, %cst_9 {dimension_numbers = #tpu.dot_dimension_numbers<[1], [0], [0], [1], [0, 0, 1, 1], [], []>} : vector<16x24xf32>, vector<24x16xf32>, vector<16x16xf32> -> vector<16x16xf32>
    %c0_10 = arith.constant 0 : index
    %c0_11 = arith.constant 0 : index
    %9 = vector.load %arg7[%c0_10, %c0_11] : memref<1x16xf32, #tpu.memory_space<vmem>>, vector<1x16xf32>
    %10 = vector.broadcast %9 : vector<1x16xf32> to vector<16x16xf32>
    %11 = arith.addf %8, %10 : vector<16x16xf32>
    %12 = tpu.iota {dimensions = array<i32: 0>} : vector<16x16xi32>
    %c16_i32 = arith.constant 16 : i32
    %c0_i32 = arith.constant 0 : i32
    %13 = arith.cmpi eq, %c16_i32, %c0_i32 : i32
    %c1_i32 = arith.constant 1 : i32
    %14 = arith.select %13, %c1_i32, %c16_i32 : i32
    %15 = vector.broadcast %14 : i32 to vector<16x16xi32>
    %16 = arith.remsi %12, %15 : vector<16x16xi32>
    %c0_i32_12 = arith.constant 0 : i32
    %17 = vector.broadcast %c0_i32_12 : i32 to vector<16x16xi32>
    %18 = arith.cmpi ne, %16, %17 : vector<16x16xi32>
    %c0_i32_13 = arith.constant 0 : i32
    %19 = vector.broadcast %c0_i32_13 : i32 to vector<16x16xi32>
    %20 = arith.cmpi slt, %16, %19 : vector<16x16xi32>
    %c0_i32_14 = arith.constant 0 : i32
    %21 = arith.cmpi slt, %14, %c0_i32_14 : i32
    %22 = vector.broadcast %21 : i1 to vector<16x16xi1>
    %23 = vector.broadcast %22 : vector<16x16xi1> to vector<16x16xi1>
    %24 = arith.xori %20, %23 : vector<16x16xi1>
    %25 = arith.andi %24, %18 : vector<16x16xi1>
    %26 = vector.broadcast %14 : i32 to vector<16x16xi32>
    %27 = arith.addi %16, %26 : vector<16x16xi32>
    %28 = arith.select %25, %27, %16 : vector<16x16xi1>, vector<16x16xi32>
    %c1_i32_15 = arith.constant 1 : i32
    %29 = tpu.dynamic_rotate %5 by %c1_i32_15 dim 0 : vector<16x16xf32>, i32 -> vector<16x16xf32>
    %c-1_i32 = arith.constant -1 : i32
    %30 = vector.broadcast %c-1_i32 : i32 to vector<16x16xi32>
    %31 = arith.addi %28, %30 : vector<16x16xi32>
    %c0_i32_16 = arith.constant 0 : i32
    %32 = vector.broadcast %c0_i32_16 : i32 to vector<16x16xi32>
    %33 = arith.cmpi sge, %31, %32 : vector<16x16xi32>
    %c-1_i32_17 = arith.constant -1 : i32
    %34 = vector.broadcast %c-1_i32_17 : i32 to vector<16x16xi32>
    %35 = arith.addi %28, %34 : vector<16x16xi32>
    %c15_i32 = arith.constant 15 : i32
    %36 = vector.broadcast %c15_i32 : i32 to vector<16x16xi32>
    %37 = arith.cmpi sle, %35, %36 : vector<16x16xi32>
    %38 = arith.andi %33, %37 : vector<16x16xi1>
    %cst_18 = arith.constant 0.000000e+00 : f32
    %39 = vector.broadcast %cst_18 : f32 to vector<16x16xf32>
    %40 = arith.select %38, %29, %39 : vector<16x16xi1>, vector<16x16xf32>
    %c15_i32_19 = arith.constant 15 : i32
    %41 = tpu.dynamic_rotate %5 by %c15_i32_19 dim 0 : vector<16x16xf32>, i32 -> vector<16x16xf32>
    %c1_i32_20 = arith.constant 1 : i32
    %42 = vector.broadcast %c1_i32_20 : i32 to vector<16x16xi32>
    %43 = arith.addi %28, %42 : vector<16x16xi32>
    %c0_i32_21 = arith.constant 0 : i32
    %44 = vector.broadcast %c0_i32_21 : i32 to vector<16x16xi32>
    %45 = arith.cmpi sge, %43, %44 : vector<16x16xi32>
    %c1_i32_22 = arith.constant 1 : i32
    %46 = vector.broadcast %c1_i32_22 : i32 to vector<16x16xi32>
    %47 = arith.addi %28, %46 : vector<16x16xi32>
    %c15_i32_23 = arith.constant 15 : i32
    %48 = vector.broadcast %c15_i32_23 : i32 to vector<16x16xi32>
    %49 = arith.cmpi sle, %47, %48 : vector<16x16xi32>
    %50 = arith.andi %45, %49 : vector<16x16xi1>
    %cst_24 = arith.constant 0.000000e+00 : f32
    %51 = vector.broadcast %cst_24 : f32 to vector<16x16xf32>
    %52 = arith.select %50, %41, %51 : vector<16x16xi1>, vector<16x16xf32>
    %53 = tpu.concatenate %40, %5, %52 in 1 : vector<16x16xf32>, vector<16x16xf32>, vector<16x16xf32> -> vector<16x48xf32>
    %c0_25 = arith.constant 0 : index
    %c0_26 = arith.constant 0 : index
    %54 = vector.load %arg5[%c0_25, %c0_26] : memref<48x16xf32, #tpu.memory_space<vmem>>, vector<48x16xf32>
    %cst_27 = arith.constant dense<0.000000e+00> : vector<16x16xf32>
    %55 = tpu.matmul %53, %54, %cst_27 {dimension_numbers = #tpu.dot_dimension_numbers<[1], [0], [0], [1], [0, 0, 1, 1], [], []>} : vector<16x48xf32>, vector<48x16xf32>, vector<16x16xf32> -> vector<16x16xf32>
    %56 = arith.addf %11, %55 : vector<16x16xf32>
    %c0_28 = arith.constant 0 : index
    %c0_29 = arith.constant 0 : index
    %57 = vector.load %arg8[%c0_28, %c0_29] : memref<16x128xf32, #tpu.memory_space<vmem>>, vector<16x128xf32>
    %cst_30 = arith.constant dense<0.000000e+00> : vector<16x128xf32>
    %58 = tpu.matmul %56, %57, %cst_30 {dimension_numbers = #tpu.dot_dimension_numbers<[1], [0], [0], [1], [0, 0, 1, 1], [], []>} : vector<16x16xf32>, vector<16x128xf32>, vector<16x128xf32> -> vector<16x128xf32>
    %c0_31 = arith.constant 0 : index
    %c0_32 = arith.constant 0 : index
    %59 = vector.load %arg9[%c0_31, %c0_32] : memref<1x128xf32, #tpu.memory_space<vmem>>, vector<1x128xf32>
    %60 = vector.broadcast %59 : vector<1x128xf32> to vector<16x128xf32>
    %61 = arith.addf %58, %60 : vector<16x128xf32>
    %c0_33 = arith.constant 0 : index
    %c0_34 = arith.constant 0 : index
    %62 = vector.load %arg10[%c0_33, %c0_34] : memref<16x128xf32, #tpu.memory_space<vmem>>, vector<16x128xf32>
    tpu.vector_store %arg10[%c0_33, %c0_34], %61 {strides = array<i32>} : memref<16x128xf32, #tpu.memory_space<vmem>>, vector<16x128xf32>,
    return
  }
  func.func @transform_0(%arg0: i32) -> (i32, i32) {
    %c0_i32 = arith.constant 0 : i32
    %c0_i32_0 = arith.constant 0 : i32
    return %arg0, %c0_i32 : i32, i32
  }
  func.func @transform_1(%arg0: i32) -> (i32, i32) {
    %c0_i32 = arith.constant 0 : i32
    %c0_i32_0 = arith.constant 0 : i32
    return %arg0, %c0_i32 : i32, i32
  }
  func.func @transform_2(%arg0: i32) -> (i32, i32) {
    %c0_i32 = arith.constant 0 : i32
    %c0_i32_0 = arith.constant 0 : i32
    %c0_i32_1 = arith.constant 0 : i32
    return %c0_i32, %c0_i32_0 : i32, i32
  }
  func.func @transform_3(%arg0: i32) -> (i32, i32) {
    %c0_i32 = arith.constant 0 : i32
    %c0_i32_0 = arith.constant 0 : i32
    %c0_i32_1 = arith.constant 0 : i32
    return %c0_i32, %c0_i32_0 : i32, i32
  }
  func.func @transform_4(%arg0: i32) -> (i32, i32) {
    %c0_i32 = arith.constant 0 : i32
    %c0_i32_0 = arith.constant 0 : i32
    %c0_i32_1 = arith.constant 0 : i32
    return %c0_i32, %c0_i32_0 : i32, i32
  }
  func.func @transform_5(%arg0: i32) -> (i32, i32) {
    %c0_i32 = arith.constant 0 : i32
    %c0_i32_0 = arith.constant 0 : i32
    %c0_i32_1 = arith.constant 0 : i32
    return %c0_i32, %c0_i32_0 : i32, i32
  }
  func.func @transform_6(%arg0: i32) -> (i32, i32) {
    %c0_i32 = arith.constant 0 : i32
    %c0_i32_0 = arith.constant 0 : i32
    %c0_i32_1 = arith.constant 0 : i32
    return %c0_i32, %c0_i32_0 : i32, i32
  }
  func.func @transform_7(%arg0: i32) -> (i32, i32) {
    %c0_i32 = arith.constant 0 : i32
    %c0_i32_0 = arith.constant 0 : i32
    %c0_i32_1 = arith.constant 0 : i32
    return %c0_i32, %c0_i32_0 : i32, i32
  }
  func.func @transform_8(%arg0: i32) -> (i32, i32) {
    %c0_i32 = arith.constant 0 : i32
    %c0_i32_0 = arith.constant 0 : i32
    %c0_i32_1 = arith.constant 0 : i32
    return %c0_i32, %c0_i32_0 : i32, i32
  }
  func.func @transform_9(%arg0: i32) -> (i32, i32) {
    %c0_i32 = arith.constant 0 : i32
    %c0_i32_0 = arith.constant 0 : i32
    return %arg0, %c0_i32 : i32, i32
  }
}

</mosaic_0001>

<bundles_post_ra>
// kernel: cnn_seq2seq_forward.1
= control target key start
LH: loop header
LB: loop body
LE: loop exit
PB: predicated region body
PF: predicated region fallthrough
CT: control target
= control target key end

     0   :  { %14 = vsyncpa [#allocation3], 0  ;;  %s1303_s0 = inlined_call_operand.vmem [shape: f32[32,24], index: 0, kind: input, shape index: {}]   ;;  %s1304_s1 = inlined_call_operand.vmem [shape: f32[32,24], index: 1, kind: input, shape index: {}]   ;;  %s1305_s2 = inlined_call_operand.vmem [shape: f32[24,16], index: 2, kind: input, shape index: {}]   ;;  %s1306_s3 = inlined_call_operand.vmem [shape: f32[1,16], index: 3, kind: input, shape index: {}]   ;;  %s1307_s4 = inlined_call_operand.vmem [shape: f32[48,16], index: 4, kind: input, shape index: {}]   ;;  %s1308_s5 = inlined_call_operand.vmem [shape: f32[24,16], index: 5, kind: input, shape index: {}]   ;;  %s1309_s6 = inlined_call_operand.vmem [shape: f32[1,16], index: 6, kind: input, shape index: {}]   ;;  %s1310_s7 = inlined_call_operand.vmem [shape: f32[16,128], index: 7, kind: input, shape index: {}]   ;;  %s1311_s8 = inlined_call_operand.vmem [shape: f32[1,128], index: 8, kind: input, shape index: {}]   ;;  %s1312_s9 = inlined_call_operand.hbm [shape: f32[32,128], index: 9, kind: output, shape index: {}]  }
   0x1   :  { %16 = vsyncpa [#allocation3 + $0x1], 0  ;;  %s1140_s30 = smov 0   ;;  %s1142_s10 = smov 0  }
   0x2   :  { %s1144_s11 = smov 0   ;;  %s1146_s12 = smov 0  }
   0x3 LB: > { %s1161_s13 = sadd.s32 4294967295, %s1083_s12   ;;  %s892_s14 = sadd.s32 4294967294, %s1083_s12   ;;  %s1083_s12 = sphi %s1146_s12, %s1318_s12   ;;  %s1079_s11 = sphi %s1144_s11, %s1317_s11   ;;  %s1075_s10 = sphi %s1142_s10, %s1316_s10   ;;  %s1071_s30 = sphi %s1140_s30, %s1315_s30  }
   0x4   : > { %s1165_s15 = sadd.s32 1, %s1083_s12   ;;  %s228_s16 = sadd.s32 1, %s1079_s11 }
   0x5   : > { %s225_s17 = ssub.s32 %s1083_s12, %s1165_s15  ;;  %p238_p0 = scmp.ne.s32.totalorder %s1079_s11, %s1075_s10 }
   0x6   : > { %p226_p1 = scmp.eq.s32.totalorder %s225_s17, 0  ;;  %p239_p2 = scmp.eq.s32.totalorder %s1161_s13, 1 }
   0x7   : > { %p244_p3 = scmp.ne.s32.totalorder %s1075_s10, %s1071_s30  ;;  %p245_p4 = scmp.eq.s32.totalorder %s892_s14, 1 }
   0x8   : > { %s1176_s18 = scalar_select %p226_p1, %s1079_s11, %s228_s16  }
   0x9   : > { %p1178_p5 = por %p239_p2, %p238_p0  ;;  %p1182_p6 = por %p245_p4, %p244_p3 }
   0xa   : > { %p895_p7 = scmp.ge.s32.totalorder %s1083_s12, 1  ;;  %p302_p8 = scmp.lt.s32.totalorder %s1083_s12, 3 }
   0xc   : > { %p303_p9 = pnand %p895_p7, %p302_p8 }
   0xd   : > { %s897_s25 = sshll.u32 (!%p303_p9), %s1161_s13, 1  ;;  %s1086_s21 = smov (!%p303_p9), 32  }
   0xe   : > { %306 = sbr.rel (%p303_p9) target bundleno = 755 (0x2f3), region = 56  ;;  %p344_p10 = scmp.lt.s32.totalorder (!%p303_p9), %s897_s25, 3 }
   0xf   : > { %s340_s27 = sand.u32 (!%p303_p9), 1, %s1075_s10   ;;  %s917_s22 = sshll.u32 (!%p303_p9), %s1161_s13, 8 }
  0x10   : > { %s896_s14 = sshll.u32 (!%p303_p9), %s340_s27, 4  ;;  %s1087_s13 = smov (!%p303_p9), [#allocation2]  }
  0x13   : > { %v360_v0 = vld [vmem:[%s1305_s2 + $0x10] sm:$0xff]  ;;  %v359_v1 = vld [vmem:[%s1305_s2 + $0x8] sm:$0xff]  ;;  %v358_v2 = vld [vmem:[%s1305_s2] sm:$0xff]  ;;  %s1320_s25 = smov (!%p344_p10, %s897_s25), 3  ;;  %vm368_vm0 = vcmask 195584   ;;  %v543_v8 = vlaneseq  ;;  %vm616_vm5 = vcmask 130048  }
  0x14   : > { %940 = vmatprep.subr.mxu1 %v360_v0  ;;  %s898_s28 = sshll.u32 %s1320_s25, 3  ;;  %v627_v5 = vld [vmem:[%s1307_s4 + $0x28] sm:$0xff]  ;;  %v454_v6 = vld [vmem:[%s1308_s5 + $0x10] sm:$0xff]  ;;  %v626_v7 = vld [vmem:[%s1307_s4 + $0x20] sm:$0xff]  ;;  %vm619_vm6 = vcmask 261120   ;;  %vm628_vm7 = vcmask 392192   ;;  %s1261_s25 = scalar_lea.hbm %s1312_s9, %s917_s22 }
  0x15   : > { %941 = vmatpush3.msra.mxu1 %v360_v0  ;;  %s347_s16 = scalar_lea.vmem %s1303_s0, %s898_s28  ;;  %958 = vmatprep.subr.mxu0 %v627_v5  ;;  %s353_s29 = scalar_lea.vmem %s1304_s1, %s898_s28  ;;  %v453_v9 = vld [vmem:[%s1308_s5 + $0x8] sm:$0xff]  ;;  %v625_v10 = vld [vmem:[%s1307_s4 + $0x18] sm:$0xff]  ;;  %v544_v11 = vshrl.u32 %v543_v8, 7  ;;  %v452_v12 = vld [vmem:[%s1308_s5] sm:$0xff] }
  0x16   : > { %942 = vmatprep.subr.mxu1 %v359_v1  ;;  %v356_v3 = vld [vmem:[%s347_s16] sm:$0xff]  ;;  %v357_v4 = vld [vmem:[%s347_s16 + $0x8] sm:$0xff]  ;;  %959 = vmatpush3.msra.mxu0 %v627_v5  ;;  %v624_v13 = vld [vmem:[%s1307_s4 + $0x10] sm:$0xff]  ;;  %s1263_s28 = scalar_lea.sflag [#allocation3], %s340_s27 }
  0x17   : > { %943 = vmatpush3.msra.mxu1 %v359_v1  ;;  %946 = vmatprep.mubr.msk.f32.mxu1 %vm368_vm0, %v356_v3  ;;  %v451_v14 = vld [vmem:[%s353_s29 + $0x8] sm:$0xff]  ;;  %v450_v15 = vld [vmem:[%s353_s29] sm:$0xff]  ;;  %v545_v17 = vadd.s32 8, %v544_v11  ;;  %v550_v18 = vand.u32 15, %v544_v11  ;;  %vm587_vm1 = vcmp.lt.s32.totalorder %v544_v11, 7  ;;  %vm572_vm2 = vcmp.lt.s32.totalorder %v544_v11, 1 }
  0x18   : > { %944 = vmatprep.subr.mxu1 %v358_v2  ;;  %960 = vmatprep.subr.mxu0 %v626_v7  ;;  %v623_v16 = vld [vmem:[%s1307_s4 + $0x8] sm:$0xff]  ;;  %v622_v19 = vld [vmem:[%s1307_s4] sm:$0xff]  ;;  %s1085_s29 = smov 16  }
  0x19   : > { %945 = vmatpush3.msra.mxu1 %v358_v2  ;;  %961 = vmatpush3.msra.mxu0 %v626_v7  ;;  %v901_v20 = vld [vmem:[%s1306_s3] ss:$0 sm:$0xff]  ;;  %v557_v22 = vand.u32 15, %v545_v17  ;;  %v575_v23 = vadd.s32 4294967295, %v550_v18  ;;  %v713_v46 = vld [vmem:[%s1310_s7 + $0x8] sm:$0xff] }
  0x1a   : > { %947 = vmatmul.mubr.msk.f32.vlgmr.msra.gmra.mxu1 %vm368_vm0, %v357_v4  ;;  %949 = vmatprep.subr.mxu1 %v454_v6  ;;  %v712_v47 = vld [vmem:[%s1310_s7] sm:$0xff] }
  0x1b   : > { %950 = vmatpush3.msra.mxu1 %v454_v6  ;;  %962 = vmatprep.subr.mxu0 %v625_v10  ;;  %v591_v27 = vadd.s32 1, %v557_v22  ;;  %vm577_vm3 = vcmp.ge.s32.totalorder %v575_v23, 0  ;;  %v904_v49 = vld [vmem:[%s1309_s6] ss:$0 sm:$0xff] }
  0x1c   : > { %951 = vmatprep.subr.mxu1 %v453_v9  ;;  %963 = vmatpush3.msra.mxu0 %v625_v10  ;;  %v909_v57 = vld [vmem:[%s1311_s8] ss:$0 sm:$0xff] }
  0x1d   : > { %952 = vmatpush3.msra.mxu1 %v453_v9  ;;  %964 = vmatprep.subr.mxu0 %v624_v13  ;;  %vm595_vm4 = vcmp.le.s32.totalorder %v591_v27, 15 }
  0x1e   : > { %953 = vmatprep.subr.mxu1 %v452_v12  ;;  %955 = vmatprep.mubr.msk.f32.mxu1 %vm368_vm0, %v450_v15 }
  0x1f   : > { %954 = vmatpush3.msra.mxu1 %v452_v12  ;;  %965 = vmatpush3.msra.mxu0 %v624_v13 }
  0x20   : > { %956 = vmatmul.mubr.msk.f32.vlgmr.msra.gmra.mxu1 %vm368_vm0, %v451_v14  ;;  %966 = vmatprep.subr.mxu0 %v623_v16 }
  0x21   : > { %967 = vmatpush3.msra.mxu0 %v623_v16  ;;  %973 = vmatprep.subr.mxu1 %v713_v46 }
  0x22   : > { %968 = vmatprep.subr.mxu0 %v622_v19  ;;  %974 = vmatpush3.msra.mxu1 %v713_v46 }
  0x23   : > { %969 = vmatpush3.msra.mxu0 %v622_v19  ;;  %975 = vmatprep.subr.mxu1 %v712_v47 }
  0x24   : > { %976 = vmatpush3.msra.mxu1 %v712_v47 }
  0xda   : > { %v948_v21 = vpop.f32.mrf.mxu1 }
  0xdb   : > { %v447_v24 = vadd.f32 %v948_v21, %v901_v20 }
  0xdc   : > { %v441_v25 = vpop.f32.mrf.mxu1 }
  0xdd   : > { %v442_v26 = vadd.f32 %v901_v20, %v441_v25  ;;  %v571_v28 = vrot.slane %v447_v24, 7  ;;  %v586_v31 = vrot.slane %v447_v24, 1 }
  0xdf   : > { %v570_v29 = vrot.slane %v442_v26, 7  ;;  %602 = vrot.lane.b32.xlu0 %v442_v26, %s1085_s29  ;;  %v585_v30 = vrot.slane %v442_v26, 1 }
  0xe0   : > { %v957_v48 = vpop.f32.mrf.mxu1 }
  0xe1   : > { %v588_v32 = vsel %vm587_vm1, %v585_v30, %v586_v31  ;;  %v574_v33 = vsel %vm572_vm2, %v571_v28, %v570_v29  ;;  %v573_v34 = vsel %vm572_vm2, %v570_v29, %v571_v28  ;;  %v589_v35 = vsel %vm587_vm1, %v586_v31, %v585_v30 }
  0xe2   : > { %610 = vrot.lane.b32.xlu1 %v588_v32, %s1086_s21  ;;  %v583_v36 = vsel %vm577_vm3, %v574_v33, 0.0  ;;  %v599_v37 = vsel %vm595_vm4, %v589_v35, 0.0  ;;  %v534_v50 = vpop.f32.mrf.mxu1  ;;  %v540_v51 = vadd.f32 %v957_v48, %v904_v49 }
  0xe3   : > { %604 = vrot.lane.b32.xlu0 %v447_v24, %s1085_s29  ;;  %v535_v53 = vadd.f32 %v904_v49, %v534_v50  ;;  %s342_s29 = scalar_lea.vmem [#allocation2], %s896_s14  ;;  %s1027_s14 = sshll.u32 %s1087_s13, 4  ;;  %s1028_s14 = int_to_ptr.vmem [resolvable:$false] %s1027_s14 }
  0xe4   : > { %s1029_s16 = scalar_lea.vmem %s1028_s14, 512 }
  0xe6   : > { %612 = vrot.lane.b32.xlu1 %v599_v37, %s1086_s21  ;;  %s818_s21 = sshll.u32 %s342_s29, 4  ;;  %s1256_s21 = int_to_ptr.vmem [resolvable:$true] %s818_s21 }
  0xe7   : > { %s1023_s26 = scalar_lea.vmem %s1256_s21, 256  ;;  %p1030_p0 = scmp.lt.s32.totalorder %s1256_s21, %s1028_s14 }
  0xe8   : > { %p1024_p11 = scmp.ne.s32.totalorder %s1256_s21, %s1023_s26  ;;  %p1031_p1 = scmp.lt.s32.totalorder %s1029_s16, %s1023_s26 }
  0xea   : > { %p1025_p12 = pnand %p1024_p11, %p1178_p5  ;;  %p1032_p2 = por %p1031_p1, %p1030_p0 }
  0xec   : > { %p1026_p13 = pneg %p1025_p12 }
  0xee   : > { %p1033_p3 = pnand %p1032_p2, %p1026_p13 }
 0x151   : > { %v603_v38 = vpop.permute.xlu0 %602 }
 0x152   : > { %v617_v39 = vsel %vm616_vm5, %v583_v36, %v603_v38 }
 0x154   : > { %v611_v40 = vpop.permute.xlu1 %610 }
 0x155   : > { %v605_v41 = vpop.permute.xlu0 %604  ;;  %v620_v42 = vsel %vm619_vm6, %v617_v39, %v611_v40 }
 0x156   : > { %970 = vmatprep.mubr.msk.f32.mxu0 %vm628_vm7, %v620_v42  ;;  %v618_v43 = vsel %vm616_vm5, %v573_v34, %v605_v41 }
 0x158   : > { %v613_v44 = vpop.permute.xlu1 %612 }
 0x159   : > { %v621_v45 = vsel %vm619_vm6, %v618_v43, %v613_v44 }
 0x15a   : > { %971 = vmatmul.mubr.msk.f32.vlgmr.msra.gmra.mxu0 %vm628_vm7, %v621_v45 }
 0x21a   : > { %v972_v52 = vpop.f32.mrf.mxu0 }
 0x21b   : > { %v711_v56 = vadd.f32 %v972_v52, %v540_v51 }
 0x21c   : > { %v701_v54 = vpop.f32.mrf.mxu0 }
 0x21d   : > { %v710_v55 = vadd.f32 %v701_v54, %v535_v53 }
 0x21f   : > { %977 = vmatprep.mubr.msk.f32.mxu1 %vm616_vm5, %v710_v55 }
 0x220   : > { %978 = vmatmul.mubr.msk.f32.vlgmr.msra.gmra.mxu1 %vm616_vm5, %v711_v56 }
 0x2e0   : > { %v979_v58 = vpop.f32.mrf.mxu1 }
 0x2e1   : > { %v799_v59 = vadd.f32 %v979_v58, %v909_v57 }
 0x2e2   : > { %v793_v60 = vpop.f32.mrf.mxu1 }
 0x2e3   : > { %803 = vst [vmem:[%s342_s29 + $0x8] sm:$0xff] %v799_v59  ;;  %v794_v61 = vadd.f32 %v909_v57, %v793_v60 }
 0x2e5   : > { %802 = vst [vmem:[%s342_s29] sm:$0xff] %v794_v61 }
 0x2e6   : > { %1036 = shalt.err (!%p1033_p3)
}
 0x2e7   : > { %s1037_s27 = scalar_lea.hbm %s1261_s25, 256  ;;  %s1041_s22 = scalar_lea.hbm %s1312_s9, 512 }
 0x2e8   : > { %p1038_p4 = scmp.ne.s32.totalorder %s1261_s25, %s1037_s27  ;;  %p1042_p9 = scmp.lt.s32.totalorder %s1261_s25, %s1312_s9 }
 0x2e9   : > { %p1043_p10 = scmp.lt.s32.totalorder %s1041_s22, %s1037_s27 }
 0x2ea   : > { %p1039_p7 = pnand %p1038_p4, %p1178_p5 }
 0x2eb   : > { %p1044_p11 = por %p1043_p10, %p1042_p9 }
 0x2ec   : > { %p1040_p8 = pneg %p1039_p7 }
 0x2ee   : > { %p1045_p12 = pnand %p1044_p11, %p1040_p8 }
 0x2f0   : > { %1048 = shalt.err (!%p1045_p12)
}
 0x2f1   : > { %s1088_s26 = smov 128   ;;  %s1089_s13 = smov 8  }
 0x2f2   : > { %980 = dma.vmem_to_hbm [thread:$0]  (%p1178_p5), %s1256_s21, 256, %s1261_s25, %s1263_s28, %s1088_s26, %s1088_s26, %s1089_s13  }
 0x2f3 PF: > { %p986_p13 = scmp.ge.s32.totalorder %s1083_s12, 2  ;;  %s833_s14 = sand.u32 1, %s1071_s30  }
 0x2f4   : > { %s834_s16 = scalar_lea.sflag [#allocation3], %s833_s14 }
 0x2f5   : > { %p983_p0 = pnand %p986_p13, %p1182_p6 }
 0x2f7   : > { %p984_p1 = pneg %p983_p0 }
 0x2f9   : > { %1066 = dma.done.wait (%p984_p1), %s834_s16, 256  }
 0x2fa   : > { %1068 = vsyncadd (%p984_p1), %s834_s16, 4294967040  ;;  %p19_p2 = scmp.ge.s32.totalorder %s1165_s15, 4   ;;  %s1315_s30 = smov %s1075_s10 }
 0x2fb   : > { %s1316_s10 = smov %s1079_s11  ;;  %s1317_s11 = smov %s1176_s18 }
 0x2fc   : > { %s1318_s12 = smov %s1165_s15  ;;  %21 = sbr.rel (!%p19_p2) target bundleno = 3 (0x3), region = 94 }
 0x301   :  { %839 = vsyncpa [#allocation3], 1 }
 0x302   :  { %841 = vsyncpa [#allocation3 + $0x1], 1 }

</bundles_post_ra>
